<compile_context>
chip_gen: v6e
topology: v6e:2x2x1
jax: 0.10.0
libtpu: 0.0.40
codegen_flags: <defaults>
</compile_context>

<pallas_src>
import jax
import jax.numpy as jnp
from jax.experimental import pallas as pl
from jax.experimental.pallas import tpu as pltpu

_LANE = 128
_MAX_TILE = 512                      # ~85% of HBM roofline per tile sweep.
_MIN_BYTES_FOR_KERNEL = 256 * 1024   # below this, XLA's fused copy wins.


def _transpose_tile_kernel(x_ref, o_ref):
    # x_ref: (TC, TL), o_ref: (TL, TC) — batch dim squeezed away.
    o_ref[...] = x_ref[...].T


def _pick_tile(dim: int, max_tile: int = _MAX_TILE) -> int:
    """Largest multiple of 128 that divides `dim` and is <= max_tile."""
    for t in range(max_tile, _LANE - 1, -_LANE):
        if dim % t == 0:
            return t
    return _LANE  # unreachable when dim % 128 == 0


def _permute_021_pallas(x: jnp.ndarray) -> jnp.ndarray:
    B, C, L = x.shape
    tc = _pick_tile(C)
    tl = _pick_tile(L)

    return pl.pallas_call(
        _transpose_tile_kernel,
        out_shape=jax.ShapeDtypeStruct((B, L, C), x.dtype),
        grid_spec=pltpu.PrefetchScalarGridSpec(
            num_scalar_prefetch=0,
            grid=(B, C // tc, L // tl),
            in_specs=[
                pl.BlockSpec((pl.Squeezed(), tc, tl),
                             lambda b, ci, lj: (b, ci, lj)),
            ],
            out_specs=pl.BlockSpec((pl.Squeezed(), tl, tc),
                                   lambda b, ci, lj: (b, lj, ci)),
        ),
        compiler_params=pltpu.CompilerParams(
            # Pure data movement, no reduction axis: everything parallel so
            # v7x can shard the grid across both TensorCores.
            dimension_semantics=("parallel", "parallel", "parallel"),
        ),
    )(x)


def permute(x: jnp.ndarray, *args) -> jnp.ndarray:
    """Pallas implementation of torch.Tensor.permute(*args).

    The tiled Pallas path handles the Mamba hot case (rank-3, perm (0,2,1),
    lane-dense C and L, non-trivial size); everything else is plain JAX.
    """
    perm = tuple(args)
    if x.ndim != 3 or perm != (0, 2, 1):
        return jnp.transpose(x, perm)

    B, C, L = x.shape
    total_bytes = x.size * x.dtype.itemsize
    lane_dense = (C % _LANE == 0) and (L % _LANE == 0)
    if (not lane_dense) or total_bytes < _MIN_BYTES_FOR_KERNEL:
        # Small tensor (per-step overhead dominates) or a shape that would
        # force masked partial stores on the output lane dim: let XLA copy.
        return jnp.transpose(x, perm)

    return _permute_021_pallas(x)


class Permute:
    """Mirror of the PyTorch nn.Module (no parameters)."""

    def __init__(self, *args):
        self.args = args

    def __call__(self, x):
        return permute(x, *self.args)


if __name__ == "__main__":
    key = jax.random.PRNGKey(0)
    k_small, k_big = jax.random.split(key)
    mod = Permute(0, 2, 1)

    # 1) Small Mamba-like shape (B, C, L) -> exercises the small-shape fallback.
    B, C, L = 2, 8, 128
    x_small = jax.random.normal(k_small, (B, C, L), dtype=jnp.float32)
    y_small = jax.block_until_ready(mod(x_small))
    assert y_small.shape == (B, L, C), y_small.shape
    assert y_small.dtype == x_small.dtype
    assert jnp.array_equal(y_small, jnp.transpose(x_small, (0, 2, 1)))

    # 2) Lane-dense shape large enough to hit the tiled Pallas transpose path.
    B2, C2, L2 = 2, 256, 384
    x_big = jax.random.normal(k_big, (B2, C2, L2), dtype=jnp.float32)
    y_big = jax.block_until_ready(mod(x_big))
    assert y_big.shape == (B2, L2, C2), y_big.shape
    assert y_big.dtype == x_big.dtype
    assert jnp.array_equal(y_big, jnp.transpose(x_big, (0, 2, 1)))

    print("KERNEL_OK")
</pallas_src>

<mosaic_0001>
module attributes {stable_mosaic.version = 11 : i64} {
  func.func @_transpose_tile_kernel(%arg0: i32, %arg1: i32, %arg2: i32, %arg3: memref<1x256x384xf32, #tpu.memory_space<vmem>>, %arg4: memref<1x384x256xf32, #tpu.memory_space<vmem>>) attributes {dimension_semantics = [#tpu.dimension_semantics<parallel>, #tpu.dimension_semantics<parallel>, #tpu.dimension_semantics<parallel>], iteration_bounds = array<i64: 2, 1, 1>, scalar_prefetch = 0 : i64, scratch_operands = 0 : i64, tpu.core_type = #tpu.core_type<tc>, window_params = [{transform_indices = @transform_0, window_bounds = array<i64: 1, 256, 384>}, {transform_indices = @transform_1, window_bounds = array<i64: 1, 384, 256>}]} {
    %c0 = arith.constant 0 : index
    %c0_0 = arith.constant 0 : index
    %c0_1 = arith.constant 0 : index
    %0 = vector.load %arg3[%c0, %c0_0, %c0_1] : memref<1x256x384xf32, #tpu.memory_space<vmem>>, vector<1x256x384xf32>
    %1 = vector.shape_cast %0 : vector<1x256x384xf32> to vector<256x384xf32>
    %2 = tpu.transpose %1, [1, 0] : vector<256x384xf32> -> vector<384x256xf32>
    %c0_2 = arith.constant 0 : index
    %c0_3 = arith.constant 0 : index
    %c0_4 = arith.constant 0 : index
    %3 = vector.load %arg4[%c0_2, %c0_3, %c0_4] : memref<1x384x256xf32, #tpu.memory_space<vmem>>, vector<1x384x256xf32>
    %4 = vector.shape_cast %3 : vector<1x384x256xf32> to vector<384x256xf32>
    %5 = vector.shape_cast %2 : vector<384x256xf32> to vector<1x384x256xf32>
    tpu.vector_store %arg4[%c0_2, %c0_3, %c0_4], %5 {strides = array<i32>} : memref<1x384x256xf32, #tpu.memory_space<vmem>>, vector<1x384x256xf32>,
    return
  }
  func.func @transform_0(%arg0: i32, %arg1: i32, %arg2: i32) -> (i32, i32, i32) {
    %c0_i32 = arith.constant 0 : i32
    return %arg0, %arg1, %arg2 : i32, i32, i32
  }
  func.func @transform_1(%arg0: i32, %arg1: i32, %arg2: i32) -> (i32, i32, i32) {
    %c0_i32 = arith.constant 0 : i32
    return %arg0, %arg2, %arg1 : i32, i32, i32
  }
}

</mosaic_0001>

<bundles_post_ra>
// kernel: tpu_custom_call.1
= control target key start
LH: loop header
LB: loop body
LE: loop exit
PB: predicated region body
PF: predicated region fallthrough
CT: control target
= control target key end

     0   :  { %6 = vsyncpa [#allocation3], 0  ;;  %s1220_s0 = inlined_call_operand.hbm [shape: f32[2,256,384], index: 0, kind: input, shape index: {}]   ;;  %s1221_s1 = inlined_call_operand.hbm [shape: f32[2,384,256], index: 1, kind: output, shape index: {}]  }
   0x1   :  { %8 = vsyncpa [#allocation3 + $0x1], 0 }
   0x2   :  { %9 = vsyncpa [#allocation4], 0 }
   0x3   :  { %11 = vsyncpa [#allocation4 + $0x1], 0  ;;  %s873_s6 = smov 0   ;;  %s875_s7 = smov 0  }
   0x4   :  { %s877_s8 = smov 0   ;;  %s879_s9 = smov 0  }
   0x5   :  { %s881_s10 = smov 0   ;;  %s883_s11 = smov 0  }
   0x6 LB: > { %s668_s12 = sadd.s32 4294967295, %s855_s11   ;;  %s669_s13 = sadd.s32 4294967294, %s855_s11   ;;  %s855_s11 = sphi %s883_s11, %s17_s11   ;;  %s851_s10 = sphi %s881_s10, %s1232_s10   ;;  %s847_s9 = sphi %s879_s9, %s1231_s9   ;;  %s843_s8 = sphi %s877_s8, %s1230_s8   ;;  %s839_s7 = sphi %s875_s7, %s1229_s7   ;;  %s835_s6 = sphi %s873_s6, %s1228_s6  }
   0x7   : > { %s36_s14 = sadd.s32 1, %s851_s10  ;;  %s47_s15 = sadd.s32 1, %s843_s8 }
   0x8   : > { %p38_p0 = scmp.ge.s32.totalorder %s36_s14, 2  ;;  %p54_p1 = scmp.ne.s32.totalorder %s843_s8, %s839_s7 }
   0x9   : > { %p55_p2 = scmp.eq.s32.totalorder %s855_s11, 0  ;;  %p60_p3 = scmp.ne.s32.totalorder %s839_s7, %s835_s6 }
   0xa   : > { %s1234_s14 = smov (%p38_p0, %s36_s14), 0  ;;  %p61_p5 = scmp.eq.s32.totalorder %s668_s12, 0 }
   0xb   : > { %p914_p4 = por %p55_p2, %p54_p1  ;;  %s40_s17 = ssub.s32 %s851_s10, %s1234_s14 }
   0xc   : > { %p88_p6 = scmp.eq.s32.totalorder %s668_s12, 1  ;;  %p45_p7 = scmp.eq.s32.totalorder %s40_s17, 0 }
   0xd   : > { %p920_p8 = por %p61_p5, %p60_p3  ;;  %p94_p10 = scmp.eq.s32.totalorder %s669_s13, 1 }
   0xe   : > { %p924_p9 = por %p88_p6, %p54_p1  ;;  %p693_p13 = scmp.lt.s32.totalorder %s855_s11, 2 }
   0xf   : > { %s929_s20 = scalar_select %p45_p7, %s843_s8, %s47_s15  }
  0x10   : > { %p931_p11 = por %p94_p10, %p60_p3  ;;  %s114_s22 = sand.u32 1, %s843_s8  }
  0x11   : > { %s677_s23 = smul.u32 768, %s114_s22  ;;  %p941_p0 = pnand %p693_p13, %p914_p4 }
  0x12   : > { %s678_s24 = smul.u32 12288, %s851_s10  ;;  %p673_p1 = scmp.ge.s32.totalorder %s855_s11, 1 }
  0x13   : > { %s118_s29 = scalar_lea.vmem [#allocation2], %s677_s23  ;;  %s115_s2 = scalar_lea.sflag [#allocation3], %s114_s22 }
  0x14   : > { %s129_s28 = scalar_lea.hbm %s1220_s0, %s678_s24  ;;  %s130_s30 = sshll.u32 %s118_s29, 4  ;;  %s131_s30 = int_to_ptr.vmem [resolvable:$true] %s130_s30 }
  0x15   : > { %p749_p2 = pneg %p941_p0  ;;  %s760_s3 = scalar_lea.vmem %s131_s30, 12288 }
  0x16   : > { %p761_p3 = scmp.ne.s32.totalorder %s131_s30, %s760_s3  ;;  %s857_s4 = smov [#allocation2]  }
  0x17   : > { %s765_s5 = sshll.u32 %s857_s4, 4  ;;  %s766_s5 = int_to_ptr.vmem [resolvable:$false] %s765_s5 }
  0x18   : > { %p763_p5 = pnand %p761_p3, %p749_p2  ;;  %s767_s12 = scalar_lea.vmem %s766_s5, 24576 }
  0x19   : > { %p768_p4 = scmp.lt.s32.totalorder %s131_s30, %s766_s5  ;;  %p769_p7 = scmp.lt.s32.totalorder %s767_s12, %s760_s3 }
  0x1a   : > { %p764_p6 = pneg %p763_p5 }
  0x1b   : > { %p770_p10 = por %p769_p7, %p768_p4 }
  0x1d   : > { %p771_p13 = pnand %p770_p10, %p764_p6 }
  0x1f   : > { %774 = shalt.err (!%p771_p13)
}
  0x20   : > { %s858_s13 = smov 384   ;;  %s859_s15 = smov 24  }
  0x21   : > { %688 = dma.hbm_to_vmem [thread:$0]  (!%p941_p0), %s129_s28, 12288, %s131_s30, %s115_s2, %s858_s13, %s858_s13, %s859_s15  }
  0x22   : > { %p138_p12 = scmp.lt.s32.totalorder %s855_s11, 3 }
  0x24   : > { %p139_p2 = pnand %p673_p1, %p138_p12 }
  0x25   : > { %s957_s16 = sand.u32 (!%p139_p2), 1, %s839_s7  }
  0x26   : > { %142 = sbr.rel (%p139_p2) target bundleno = 372 (0x174), region = 24  ;;  %s145_s22 = scalar_lea.sflag (!%p139_p2), [#allocation3], %s957_s16 }
  0x27   : > { %s679_s17 = smul.u32 (!%p139_p2), 768, %s957_s16 }
  0x29   : > { %s963_s23 = scalar_lea.vmem (!%p139_p2), [#allocation2], %s679_s17 }
  0x2b   : > { %826 = dma.done.wait (%p920_p8), %s145_s22, 12288  }
  0x2c   : > { %828 = vsyncadd (%p920_p8), %s145_s22, 4294955008  ;;  %v172_v0 = vld [vmem:[%s963_s23 + $0x8] sm:$0xff]  ;;  %v171_v1 = vld [vmem:[%s963_s23] sm:$0xff]  ;;  %s1035_s18 = scalar_lea.vmem [#allocation5], %s679_s17  ;;  %s680_s24 = smul.u32 12288, %s847_s9 }
  0x2d   : > { %299 = vxpose.xlu1.b32.start [1/16] %v172_v0, 128  ;;  %267 = vxpose.xlu0.b32.start [1/16] %v171_v1, 128  ;;  %v175_v2 = vld [vmem:[%s963_s23 + $0x20] sm:$0xff]  ;;  %v174_v3 = vld [vmem:[%s963_s23 + $0x18] sm:$0xff]  ;;  %v177_v5 = vld [vmem:[%s963_s23 + $0x30] sm:$0xff]  ;;  %s574_s25 = sshll.u32 %s1035_s18, 4  ;;  %s556_s9 = scalar_lea.sflag [#allocation4], %s957_s16  ;;  %s1170_s25 = int_to_ptr.vmem [resolvable:$true] %s574_s25 }
  0x2e   : > { %v178_v4 = vld [vmem:[%s963_s23 + $0x38] sm:$0xff]  ;;  %v181_v6 = vld [vmem:[%s963_s23 + $0x50] sm:$0xff]  ;;  %v180_v7 = vld [vmem:[%s963_s23 + $0x48] sm:$0xff]  ;;  %s1168_s28 = scalar_lea.hbm %s1221_s1, %s680_s24  ;;  %s775_s29 = scalar_lea.vmem %s1170_s25, 12288 }
  0x2f   : > { %v184_v8 = vld [vmem:[%s963_s23 + $0x68] sm:$0xff]  ;;  %v183_v9 = vld [vmem:[%s963_s23 + $0x60] sm:$0xff]  ;;  %v186_v11 = vld [vmem:[%s963_s23 + $0x78] sm:$0xff]  ;;  %p776_p8 = scmp.ne.s32.totalorder %s1170_s25, %s775_s29  ;;  %s860_s30 = smov [#allocation5]  }
  0x30   : > { %v187_v10 = vld [vmem:[%s963_s23 + $0x80] sm:$0xff]  ;;  %v190_v12 = vld [vmem:[%s963_s23 + $0x98] sm:$0xff]  ;;  %v189_v13 = vld [vmem:[%s963_s23 + $0x90] sm:$0xff]  ;;  %s779_s2 = sshll.u32 %s860_s30, 4  ;;  %s780_s2 = int_to_ptr.vmem [resolvable:$false] %s779_s2 }
  0x31   : > { %300 = vxpose.xlu1.b32.cont [2/16] %v175_v2, 128  ;;  %268 = vxpose.xlu0.b32.cont [2/16] %v174_v3, 128  ;;  %v193_v14 = vld [vmem:[%s963_s23 + $0xb0] sm:$0xff]  ;;  %v192_v15 = vld [vmem:[%s963_s23 + $0xa8] sm:$0xff]  ;;  %v195_v17 = vld [vmem:[%s963_s23 + $0xc0] sm:$0xff]  ;;  %p777_p12 = pnand %p776_p8, %p924_p9  ;;  %s781_s3 = scalar_lea.vmem %s780_s2, 24576 }
  0x32   : > { %v196_v16 = vld [vmem:[%s963_s23 + $0xc8] sm:$0xff]  ;;  %v199_v18 = vld [vmem:[%s963_s23 + $0xe0] sm:$0xff]  ;;  %v198_v19 = vld [vmem:[%s963_s23 + $0xd8] sm:$0xff]  ;;  %p782_p1 = scmp.lt.s32.totalorder %s1170_s25, %s780_s2  ;;  %p783_p3 = scmp.lt.s32.totalorder %s781_s3, %s775_s29 }
  0x33   : > { %v202_v20 = vld [vmem:[%s963_s23 + $0xf8] sm:$0xff]  ;;  %v201_v21 = vld [vmem:[%s963_s23 + $0xf0] sm:$0xff]  ;;  %v204_v23 = vld [vmem:[%s963_s23 + $0x108] sm:$0xff]  ;;  %p778_p0 = pneg %p777_p12 }
  0x34   : > { %v205_v22 = vld [vmem:[%s963_s23 + $0x110] sm:$0xff]  ;;  %v208_v24 = vld [vmem:[%s963_s23 + $0x128] sm:$0xff]  ;;  %v207_v25 = vld [vmem:[%s963_s23 + $0x120] sm:$0xff]  ;;  %p784_p5 = por %p783_p3, %p782_p1 }
  0x35   : > { %301 = vxpose.xlu1.b32.cont [3/16] %v178_v4, 128  ;;  %269 = vxpose.xlu0.b32.cont [3/16] %v177_v5, 128  ;;  %v211_v26 = vld [vmem:[%s963_s23 + $0x140] sm:$0xff]  ;;  %v210_v27 = vld [vmem:[%s963_s23 + $0x138] sm:$0xff]  ;;  %v213_v29 = vld [vmem:[%s963_s23 + $0x150] sm:$0xff] }
  0x36   : > { %v214_v28 = vld [vmem:[%s963_s23 + $0x158] sm:$0xff]  ;;  %v217_v30 = vld [vmem:[%s963_s23 + $0x170] sm:$0xff]  ;;  %v216_v31 = vld [vmem:[%s963_s23 + $0x168] sm:$0xff]  ;;  %p785_p6 = pnand %p784_p5, %p778_p0 }
  0x37   : > { %v219_v32 = vld [vmem:[%s963_s23 + $0x180] sm:$0xff]  ;;  %v173_v33 = vld [vmem:[%s963_s23 + $0x10] sm:$0xff]  ;;  %v222_v34 = vld [vmem:[%s963_s23 + $0x198] sm:$0xff] }
  0x38   : > { %v176_v35 = vld [vmem:[%s963_s23 + $0x28] sm:$0xff]  ;;  %v225_v36 = vld [vmem:[%s963_s23 + $0x1b0] sm:$0xff]  ;;  %v179_v37 = vld [vmem:[%s963_s23 + $0x40] sm:$0xff] }
  0x39   : > { %302 = vxpose.xlu1.b32.cont [4/16] %v181_v6, 128  ;;  %270 = vxpose.xlu0.b32.cont [4/16] %v180_v7, 128  ;;  %v228_v38 = vld [vmem:[%s963_s23 + $0x1c8] sm:$0xff]  ;;  %v182_v39 = vld [vmem:[%s963_s23 + $0x58] sm:$0xff]  ;;  %v231_v40 = vld [vmem:[%s963_s23 + $0x1e0] sm:$0xff] }
  0x3a   : > { %v185_v41 = vld [vmem:[%s963_s23 + $0x70] sm:$0xff]  ;;  %v234_v42 = vld [vmem:[%s963_s23 + $0x1f8] sm:$0xff]  ;;  %v188_v43 = vld [vmem:[%s963_s23 + $0x88] sm:$0xff] }
  0x3b   : > { %v237_v44 = vld [vmem:[%s963_s23 + $0x210] sm:$0xff]  ;;  %v191_v45 = vld [vmem:[%s963_s23 + $0xa0] sm:$0xff]  ;;  %v240_v46 = vld [vmem:[%s963_s23 + $0x228] sm:$0xff] }
  0x3c   : > { %v194_v47 = vld [vmem:[%s963_s23 + $0xb8] sm:$0xff]  ;;  %v243_v48 = vld [vmem:[%s963_s23 + $0x240] sm:$0xff]  ;;  %v197_v49 = vld [vmem:[%s963_s23 + $0xd0] sm:$0xff] }
  0x3d   : > { %303 = vxpose.xlu1.b32.cont [5/16] %v184_v8, 128  ;;  %271 = vxpose.xlu0.b32.cont [5/16] %v183_v9, 128  ;;  %v246_v50 = vld [vmem:[%s963_s23 + $0x258] sm:$0xff]  ;;  %v200_v51 = vld [vmem:[%s963_s23 + $0xe8] sm:$0xff]  ;;  %v249_v52 = vld [vmem:[%s963_s23 + $0x270] sm:$0xff] }
  0x3e   : > { %v203_v53 = vld [vmem:[%s963_s23 + $0x100] sm:$0xff]  ;;  %v252_v54 = vld [vmem:[%s963_s23 + $0x288] sm:$0xff]  ;;  %v206_v55 = vld [vmem:[%s963_s23 + $0x118] sm:$0xff] }
  0x3f   : > { %v255_v56 = vld [vmem:[%s963_s23 + $0x2a0] sm:$0xff]  ;;  %v209_v57 = vld [vmem:[%s963_s23 + $0x130] sm:$0xff]  ;;  %v258_v58 = vld [vmem:[%s963_s23 + $0x2b8] sm:$0xff] }
  0x40   : > { %v212_v59 = vld [vmem:[%s963_s23 + $0x148] sm:$0xff]  ;;  %v261_v60 = vld [vmem:[%s963_s23 + $0x2d0] sm:$0xff]  ;;  %v215_v61 = vld [vmem:[%s963_s23 + $0x160] sm:$0xff] }
  0x41   : > { %304 = vxpose.xlu1.b32.cont [6/16] %v187_v10, 128  ;;  %272 = vxpose.xlu0.b32.cont [6/16] %v186_v11, 128  ;;  %v264_v62 = vld [vmem:[%s963_s23 + $0x2e8] sm:$0xff]  ;;  %v218_v63 = vld [vmem:[%s963_s23 + $0x178] sm:$0xff]  ;;  %v221_v2 = vld [vmem:[%s963_s23 + $0x190] sm:$0xff] }
  0x42   : > { %v220_v3 = vld [vmem:[%s963_s23 + $0x188] sm:$0xff]  ;;  %v223_v7 = vld [vmem:[%s963_s23 + $0x1a0] sm:$0xff]  ;;  %v226_v11 = vld [vmem:[%s963_s23 + $0x1b8] sm:$0xff] }
  0x43   : > { %v224_v6 = vld [vmem:[%s963_s23 + $0x1a8] sm:$0xff]  ;;  %v227_v10 = vld [vmem:[%s963_s23 + $0x1c0] sm:$0xff] }
  0x45   : > { %305 = vxpose.xlu1.b32.cont [7/16] %v190_v12, 128  ;;  %273 = vxpose.xlu0.b32.cont [7/16] %v189_v13, 128 }
  0x49   : > { %306 = vxpose.xlu1.b32.cont [8/16] %v193_v14, 128  ;;  %274 = vxpose.xlu0.b32.cont [8/16] %v192_v15, 128  ;;  %v230_v14 = vld [vmem:[%s963_s23 + $0x1d8] sm:$0xff]  ;;  %v229_v15 = vld [vmem:[%s963_s23 + $0x1d0] sm:$0xff] }
  0x4d   : > { %307 = vxpose.xlu1.b32.cont [9/16] %v196_v16, 128  ;;  %275 = vxpose.xlu0.b32.cont [9/16] %v195_v17, 128 }
  0x51   : > { %308 = vxpose.xlu1.b32.cont [10/16] %v199_v18, 128  ;;  %276 = vxpose.xlu0.b32.cont [10/16] %v198_v19, 128  ;;  %v233_v18 = vld [vmem:[%s963_s23 + $0x1f0] sm:$0xff]  ;;  %v232_v19 = vld [vmem:[%s963_s23 + $0x1e8] sm:$0xff] }
  0x55   : > { %309 = vxpose.xlu1.b32.cont [11/16] %v202_v20, 128  ;;  %277 = vxpose.xlu0.b32.cont [11/16] %v201_v21, 128 }
  0x59   : > { %310 = vxpose.xlu1.b32.cont [12/16] %v205_v22, 128  ;;  %278 = vxpose.xlu0.b32.cont [12/16] %v204_v23, 128  ;;  %v236_v22 = vld [vmem:[%s963_s23 + $0x208] sm:$0xff]  ;;  %v235_v23 = vld [vmem:[%s963_s23 + $0x200] sm:$0xff] }
  0x5d   : > { %311 = vxpose.xlu1.b32.cont [13/16] %v208_v24, 128  ;;  %279 = vxpose.xlu0.b32.cont [13/16] %v207_v25, 128 }
  0x61   : > { %312 = vxpose.xlu1.b32.cont [14/16] %v211_v26, 128  ;;  %280 = vxpose.xlu0.b32.cont [14/16] %v210_v27, 128  ;;  %v239_v26 = vld [vmem:[%s963_s23 + $0x220] sm:$0xff]  ;;  %v238_v27 = vld [vmem:[%s963_s23 + $0x218] sm:$0xff] }
  0x65   : > { %313 = vxpose.xlu1.b32.cont [15/16] %v214_v28, 128  ;;  %281 = vxpose.xlu0.b32.cont [15/16] %v213_v29, 128 }
  0x69   : > { %314 = vxpose.xlu1.b32.end [16/16] %v217_v30, 128  ;;  %282 = vxpose.xlu0.b32.end [16/16] %v216_v31, 128  ;;  %v242_v30 = vld [vmem:[%s963_s23 + $0x238] sm:$0xff]  ;;  %v241_v31 = vld [vmem:[%s963_s23 + $0x230] sm:$0xff] }
  0x6d   : > { %363 = vxpose.xlu1.b32.start [1/16] %v219_v32, 128  ;;  %331 = vxpose.xlu0.b32.start [1/16] %v173_v33, 128 }
  0x71   : > { %364 = vxpose.xlu1.b32.cont [2/16] %v222_v34, 128  ;;  %332 = vxpose.xlu0.b32.cont [2/16] %v176_v35, 128  ;;  %v245_v34 = vld [vmem:[%s963_s23 + $0x250] sm:$0xff]  ;;  %v244_v35 = vld [vmem:[%s963_s23 + $0x248] sm:$0xff] }
  0x75   : > { %365 = vxpose.xlu1.b32.cont [3/16] %v225_v36, 128  ;;  %333 = vxpose.xlu0.b32.cont [3/16] %v179_v37, 128 }
  0x79   : > { %366 = vxpose.xlu1.b32.cont [4/16] %v228_v38, 128  ;;  %334 = vxpose.xlu0.b32.cont [4/16] %v182_v39, 128  ;;  %v248_v38 = vld [vmem:[%s963_s23 + $0x268] sm:$0xff]  ;;  %v247_v39 = vld [vmem:[%s963_s23 + $0x260] sm:$0xff] }
  0x7d   : > { %367 = vxpose.xlu1.b32.cont [5/16] %v231_v40, 128  ;;  %335 = vxpose.xlu0.b32.cont [5/16] %v185_v41, 128 }
  0x81   : > { %368 = vxpose.xlu1.b32.cont [6/16] %v234_v42, 128  ;;  %336 = vxpose.xlu0.b32.cont [6/16] %v188_v43, 128  ;;  %v251_v42 = vld [vmem:[%s963_s23 + $0x280] sm:$0xff]  ;;  %v250_v43 = vld [vmem:[%s963_s23 + $0x278] sm:$0xff] }
  0x85   : > { %369 = vxpose.xlu1.b32.cont [7/16] %v237_v44, 128  ;;  %337 = vxpose.xlu0.b32.cont [7/16] %v191_v45, 128 }
  0x89   : > { %370 = vxpose.xlu1.b32.cont [8/16] %v240_v46, 128  ;;  %338 = vxpose.xlu0.b32.cont [8/16] %v194_v47, 128  ;;  %v254_v46 = vld [vmem:[%s963_s23 + $0x298] sm:$0xff]  ;;  %v253_v47 = vld [vmem:[%s963_s23 + $0x290] sm:$0xff] }
  0x8d   : > { %371 = vxpose.xlu1.b32.cont [9/16] %v243_v48, 128  ;;  %339 = vxpose.xlu0.b32.cont [9/16] %v197_v49, 128 }
  0x91   : > { %372 = vxpose.xlu1.b32.cont [10/16] %v246_v50, 128  ;;  %340 = vxpose.xlu0.b32.cont [10/16] %v200_v51, 128  ;;  %v257_v50 = vld [vmem:[%s963_s23 + $0x2b0] sm:$0xff]  ;;  %v256_v51 = vld [vmem:[%s963_s23 + $0x2a8] sm:$0xff] }
  0x95   : > { %373 = vxpose.xlu1.b32.cont [11/16] %v249_v52, 128  ;;  %341 = vxpose.xlu0.b32.cont [11/16] %v203_v53, 128 }
  0x99   : > { %374 = vxpose.xlu1.b32.cont [12/16] %v252_v54, 128  ;;  %342 = vxpose.xlu0.b32.cont [12/16] %v206_v55, 128  ;;  %v260_v54 = vld [vmem:[%s963_s23 + $0x2c8] sm:$0xff]  ;;  %v259_v55 = vld [vmem:[%s963_s23 + $0x2c0] sm:$0xff] }
  0x9d   : > { %375 = vxpose.xlu1.b32.cont [13/16] %v255_v56, 128  ;;  %343 = vxpose.xlu0.b32.cont [13/16] %v209_v57, 128 }
  0xa1   : > { %376 = vxpose.xlu1.b32.cont [14/16] %v258_v58, 128  ;;  %344 = vxpose.xlu0.b32.cont [14/16] %v212_v59, 128  ;;  %v263_v58 = vld [vmem:[%s963_s23 + $0x2e0] sm:$0xff]  ;;  %v262_v59 = vld [vmem:[%s963_s23 + $0x2d8] sm:$0xff] }
  0xa5   : > { %377 = vxpose.xlu1.b32.cont [15/16] %v261_v60, 128  ;;  %345 = vxpose.xlu0.b32.cont [15/16] %v215_v61, 128 }
  0xa9   : > { %378 = vxpose.xlu1.b32.end [16/16] %v264_v62, 128  ;;  %v315_v0 = vpop.trf.xlu1  ;;  %346 = vxpose.xlu0.b32.end [16/16] %v218_v63, 128  ;;  %v283_v1 = vpop.trf.xlu0  ;;  %v266_v62 = vld [vmem:[%s963_s23 + $0x2f8] sm:$0xff]  ;;  %v265_v63 = vld [vmem:[%s963_s23 + $0x2f0] sm:$0xff] }
  0xaa   : > { %491 = vst [vmem:[%s1035_s18 + $0x100] sm:$0xff] %v315_v0  ;;  %459 = vst [vmem:[%s1035_s18] sm:$0xff] %v283_v1 }
  0xad   : > { %427 = vxpose.xlu1.b32.start [1/16] %v221_v2, 128  ;;  %v316_v4 = vpop.trf.xlu1  ;;  %395 = vxpose.xlu0.b32.start [1/16] %v220_v3, 128  ;;  %v284_v5 = vpop.trf.xlu0 }
  0xae   : > { %493 = vst [vmem:[%s1035_s18 + $0x110] sm:$0xff] %v316_v4  ;;  %461 = vst [vmem:[%s1035_s18 + $0x10] sm:$0xff] %v284_v5 }
  0xb1   : > { %428 = vxpose.xlu1.b32.cont [2/16] %v224_v6, 128  ;;  %v317_v8 = vpop.trf.xlu1  ;;  %396 = vxpose.xlu0.b32.cont [2/16] %v223_v7, 128  ;;  %v285_v9 = vpop.trf.xlu0 }
  0xb2   : > { %495 = vst [vmem:[%s1035_s18 + $0x120] sm:$0xff] %v317_v8  ;;  %463 = vst [vmem:[%s1035_s18 + $0x20] sm:$0xff] %v285_v9 }
  0xb5   : > { %429 = vxpose.xlu1.b32.cont [3/16] %v227_v10, 128  ;;  %v318_v12 = vpop.trf.xlu1  ;;  %397 = vxpose.xlu0.b32.cont [3/16] %v226_v11, 128  ;;  %v286_v13 = vpop.trf.xlu0 }
  0xb6   : > { %497 = vst [vmem:[%s1035_s18 + $0x130] sm:$0xff] %v318_v12  ;;  %465 = vst [vmem:[%s1035_s18 + $0x30] sm:$0xff] %v286_v13 }
  0xb9   : > { %430 = vxpose.xlu1.b32.cont [4/16] %v230_v14, 128  ;;  %v319_v16 = vpop.trf.xlu1  ;;  %398 = vxpose.xlu0.b32.cont [4/16] %v229_v15, 128  ;;  %v287_v17 = vpop.trf.xlu0 }
  0xba   : > { %499 = vst [vmem:[%s1035_s18 + $0x140] sm:$0xff] %v319_v16  ;;  %467 = vst [vmem:[%s1035_s18 + $0x40] sm:$0xff] %v287_v17 }
  0xbd   : > { %431 = vxpose.xlu1.b32.cont [5/16] %v233_v18, 128  ;;  %v320_v20 = vpop.trf.xlu1  ;;  %399 = vxpose.xlu0.b32.cont [5/16] %v232_v19, 128  ;;  %v288_v21 = vpop.trf.xlu0 }
  0xbe   : > { %501 = vst [vmem:[%s1035_s18 + $0x150] sm:$0xff] %v320_v20  ;;  %469 = vst [vmem:[%s1035_s18 + $0x50] sm:$0xff] %v288_v21 }
  0xc1   : > { %432 = vxpose.xlu1.b32.cont [6/16] %v236_v22, 128  ;;  %v321_v24 = vpop.trf.xlu1  ;;  %400 = vxpose.xlu0.b32.cont [6/16] %v235_v23, 128  ;;  %v289_v25 = vpop.trf.xlu0 }
  0xc2   : > { %503 = vst [vmem:[%s1035_s18 + $0x160] sm:$0xff] %v321_v24  ;;  %471 = vst [vmem:[%s1035_s18 + $0x60] sm:$0xff] %v289_v25 }
  0xc5   : > { %433 = vxpose.xlu1.b32.cont [7/16] %v239_v26, 128  ;;  %v322_v28 = vpop.trf.xlu1  ;;  %401 = vxpose.xlu0.b32.cont [7/16] %v238_v27, 128  ;;  %v290_v29 = vpop.trf.xlu0 }
  0xc6   : > { %505 = vst [vmem:[%s1035_s18 + $0x170] sm:$0xff] %v322_v28  ;;  %473 = vst [vmem:[%s1035_s18 + $0x70] sm:$0xff] %v290_v29 }
  0xc9   : > { %434 = vxpose.xlu1.b32.cont [8/16] %v242_v30, 128  ;;  %v323_v32 = vpop.trf.xlu1  ;;  %402 = vxpose.xlu0.b32.cont [8/16] %v241_v31, 128  ;;  %v291_v33 = vpop.trf.xlu0 }
  0xca   : > { %507 = vst [vmem:[%s1035_s18 + $0x180] sm:$0xff] %v323_v32  ;;  %475 = vst [vmem:[%s1035_s18 + $0x80] sm:$0xff] %v291_v33 }
  0xcd   : > { %435 = vxpose.xlu1.b32.cont [9/16] %v245_v34, 128  ;;  %v324_v36 = vpop.trf.xlu1  ;;  %403 = vxpose.xlu0.b32.cont [9/16] %v244_v35, 128  ;;  %v292_v37 = vpop.trf.xlu0 }
  0xce   : > { %509 = vst [vmem:[%s1035_s18 + $0x190] sm:$0xff] %v324_v36  ;;  %477 = vst [vmem:[%s1035_s18 + $0x90] sm:$0xff] %v292_v37 }
  0xd1   : > { %436 = vxpose.xlu1.b32.cont [10/16] %v248_v38, 128  ;;  %v325_v40 = vpop.trf.xlu1  ;;  %404 = vxpose.xlu0.b32.cont [10/16] %v247_v39, 128  ;;  %v293_v41 = vpop.trf.xlu0 }
  0xd2   : > { %511 = vst [vmem:[%s1035_s18 + $0x1a0] sm:$0xff] %v325_v40  ;;  %479 = vst [vmem:[%s1035_s18 + $0xa0] sm:$0xff] %v293_v41 }
  0xd5   : > { %437 = vxpose.xlu1.b32.cont [11/16] %v251_v42, 128  ;;  %v326_v44 = vpop.trf.xlu1  ;;  %405 = vxpose.xlu0.b32.cont [11/16] %v250_v43, 128  ;;  %v294_v45 = vpop.trf.xlu0 }
  0xd6   : > { %513 = vst [vmem:[%s1035_s18 + $0x1b0] sm:$0xff] %v326_v44  ;;  %481 = vst [vmem:[%s1035_s18 + $0xb0] sm:$0xff] %v294_v45 }
  0xd9   : > { %438 = vxpose.xlu1.b32.cont [12/16] %v254_v46, 128  ;;  %v327_v48 = vpop.trf.xlu1  ;;  %406 = vxpose.xlu0.b32.cont [12/16] %v253_v47, 128  ;;  %v295_v49 = vpop.trf.xlu0 }
  0xda   : > { %515 = vst [vmem:[%s1035_s18 + $0x1c0] sm:$0xff] %v327_v48  ;;  %483 = vst [vmem:[%s1035_s18 + $0xc0] sm:$0xff] %v295_v49 }
  0xdd   : > { %439 = vxpose.xlu1.b32.cont [13/16] %v257_v50, 128  ;;  %v328_v52 = vpop.trf.xlu1  ;;  %407 = vxpose.xlu0.b32.cont [13/16] %v256_v51, 128  ;;  %v296_v53 = vpop.trf.xlu0 }
  0xde   : > { %517 = vst [vmem:[%s1035_s18 + $0x1d0] sm:$0xff] %v328_v52  ;;  %485 = vst [vmem:[%s1035_s18 + $0xd0] sm:$0xff] %v296_v53 }
  0xe1   : > { %440 = vxpose.xlu1.b32.cont [14/16] %v260_v54, 128  ;;  %v329_v56 = vpop.trf.xlu1  ;;  %408 = vxpose.xlu0.b32.cont [14/16] %v259_v55, 128  ;;  %v297_v57 = vpop.trf.xlu0 }
  0xe2   : > { %519 = vst [vmem:[%s1035_s18 + $0x1e0] sm:$0xff] %v329_v56  ;;  %487 = vst [vmem:[%s1035_s18 + $0xe0] sm:$0xff] %v297_v57 }
  0xe5   : > { %441 = vxpose.xlu1.b32.cont [15/16] %v263_v58, 128  ;;  %v330_v60 = vpop.trf.xlu1  ;;  %409 = vxpose.xlu0.b32.cont [15/16] %v262_v59, 128  ;;  %v298_v61 = vpop.trf.xlu0 }
  0xe6   : > { %521 = vst [vmem:[%s1035_s18 + $0x1f0] sm:$0xff] %v330_v60  ;;  %489 = vst [vmem:[%s1035_s18 + $0xf0] sm:$0xff] %v298_v61 }
  0xe9   : > { %442 = vxpose.xlu1.b32.end [16/16] %v266_v62, 128  ;;  %v379_v0 = vpop.trf.xlu1  ;;  %410 = vxpose.xlu0.b32.end [16/16] %v265_v63, 128  ;;  %v347_v1 = vpop.trf.xlu0 }
  0xea   : > { %460 = vst [vmem:[%s1035_s18 + $0x8] sm:$0xff] %v379_v0  ;;  %523 = vst [vmem:[%s1035_s18 + $0x200] sm:$0xff] %v347_v1 }
  0xed   : > { %v380_v2 = vpop.trf.xlu1  ;;  %v348_v3 = vpop.trf.xlu0 }
  0xee   : > { %462 = vst [vmem:[%s1035_s18 + $0x18] sm:$0xff] %v380_v2  ;;  %525 = vst [vmem:[%s1035_s18 + $0x210] sm:$0xff] %v348_v3 }
  0xf1   : > { %v381_v4 = vpop.trf.xlu1  ;;  %v349_v5 = vpop.trf.xlu0 }
  0xf2   : > { %464 = vst [vmem:[%s1035_s18 + $0x28] sm:$0xff] %v381_v4  ;;  %527 = vst [vmem:[%s1035_s18 + $0x220] sm:$0xff] %v349_v5 }
  0xf5   : > { %v382_v6 = vpop.trf.xlu1  ;;  %v350_v7 = vpop.trf.xlu0 }
  0xf6   : > { %466 = vst [vmem:[%s1035_s18 + $0x38] sm:$0xff] %v382_v6  ;;  %529 = vst [vmem:[%s1035_s18 + $0x230] sm:$0xff] %v350_v7 }
  0xf9   : > { %v383_v8 = vpop.trf.xlu1  ;;  %v351_v9 = vpop.trf.xlu0 }
  0xfa   : > { %468 = vst [vmem:[%s1035_s18 + $0x48] sm:$0xff] %v383_v8  ;;  %531 = vst [vmem:[%s1035_s18 + $0x240] sm:$0xff] %v351_v9 }
  0xfd   : > { %v384_v10 = vpop.trf.xlu1  ;;  %v352_v11 = vpop.trf.xlu0 }
  0xfe   : > { %470 = vst [vmem:[%s1035_s18 + $0x58] sm:$0xff] %v384_v10  ;;  %533 = vst [vmem:[%s1035_s18 + $0x250] sm:$0xff] %v352_v11 }
 0x101   : > { %v385_v12 = vpop.trf.xlu1  ;;  %v353_v13 = vpop.trf.xlu0 }
 0x102   : > { %472 = vst [vmem:[%s1035_s18 + $0x68] sm:$0xff] %v385_v12  ;;  %535 = vst [vmem:[%s1035_s18 + $0x260] sm:$0xff] %v353_v13 }
 0x105   : > { %v386_v14 = vpop.trf.xlu1  ;;  %v354_v15 = vpop.trf.xlu0 }
 0x106   : > { %474 = vst [vmem:[%s1035_s18 + $0x78] sm:$0xff] %v386_v14  ;;  %537 = vst [vmem:[%s1035_s18 + $0x270] sm:$0xff] %v354_v15 }
 0x109   : > { %v387_v16 = vpop.trf.xlu1  ;;  %v355_v17 = vpop.trf.xlu0 }
 0x10a   : > { %476 = vst [vmem:[%s1035_s18 + $0x88] sm:$0xff] %v387_v16  ;;  %539 = vst [vmem:[%s1035_s18 + $0x280] sm:$0xff] %v355_v17 }
 0x10d   : > { %v388_v18 = vpop.trf.xlu1  ;;  %v356_v19 = vpop.trf.xlu0 }
 0x10e   : > { %478 = vst [vmem:[%s1035_s18 + $0x98] sm:$0xff] %v388_v18  ;;  %541 = vst [vmem:[%s1035_s18 + $0x290] sm:$0xff] %v356_v19 }
 0x111   : > { %v389_v20 = vpop.trf.xlu1  ;;  %v357_v21 = vpop.trf.xlu0 }
 0x112   : > { %480 = vst [vmem:[%s1035_s18 + $0xa8] sm:$0xff] %v389_v20  ;;  %543 = vst [vmem:[%s1035_s18 + $0x2a0] sm:$0xff] %v357_v21 }
 0x115   : > { %v390_v22 = vpop.trf.xlu1  ;;  %v358_v23 = vpop.trf.xlu0 }
 0x116   : > { %482 = vst [vmem:[%s1035_s18 + $0xb8] sm:$0xff] %v390_v22  ;;  %545 = vst [vmem:[%s1035_s18 + $0x2b0] sm:$0xff] %v358_v23 }
 0x119   : > { %v391_v24 = vpop.trf.xlu1  ;;  %v359_v25 = vpop.trf.xlu0 }
 0x11a   : > { %484 = vst [vmem:[%s1035_s18 + $0xc8] sm:$0xff] %v391_v24  ;;  %547 = vst [vmem:[%s1035_s18 + $0x2c0] sm:$0xff] %v359_v25 }
 0x11d   : > { %v392_v26 = vpop.trf.xlu1  ;;  %v360_v27 = vpop.trf.xlu0 }
 0x11e   : > { %486 = vst [vmem:[%s1035_s18 + $0xd8] sm:$0xff] %v392_v26  ;;  %549 = vst [vmem:[%s1035_s18 + $0x2d0] sm:$0xff] %v360_v27 }
 0x121   : > { %v393_v28 = vpop.trf.xlu1  ;;  %v361_v29 = vpop.trf.xlu0 }
 0x122   : > { %488 = vst [vmem:[%s1035_s18 + $0xe8] sm:$0xff] %v393_v28  ;;  %551 = vst [vmem:[%s1035_s18 + $0x2e0] sm:$0xff] %v361_v29 }
 0x125   : > { %v394_v30 = vpop.trf.xlu1  ;;  %v362_v31 = vpop.trf.xlu0 }
 0x126   : > { %490 = vst [vmem:[%s1035_s18 + $0xf8] sm:$0xff] %v394_v30  ;;  %553 = vst [vmem:[%s1035_s18 + $0x2f0] sm:$0xff] %v362_v31 }
 0x129   : > { %v443_v32 = vpop.trf.xlu1  ;;  %v411_v33 = vpop.trf.xlu0 }
 0x12a   : > { %524 = vst [vmem:[%s1035_s18 + $0x208] sm:$0xff] %v443_v32  ;;  %492 = vst [vmem:[%s1035_s18 + $0x108] sm:$0xff] %v411_v33 }
 0x12d   : > { %v444_v34 = vpop.trf.xlu1  ;;  %v412_v35 = vpop.trf.xlu0 }
 0x12e   : > { %526 = vst [vmem:[%s1035_s18 + $0x218] sm:$0xff] %v444_v34  ;;  %494 = vst [vmem:[%s1035_s18 + $0x118] sm:$0xff] %v412_v35 }
 0x131   : > { %v445_v36 = vpop.trf.xlu1  ;;  %v413_v37 = vpop.trf.xlu0 }
 0x132   : > { %528 = vst [vmem:[%s1035_s18 + $0x228] sm:$0xff] %v445_v36  ;;  %496 = vst [vmem:[%s1035_s18 + $0x128] sm:$0xff] %v413_v37 }
 0x135   : > { %v446_v38 = vpop.trf.xlu1  ;;  %v414_v39 = vpop.trf.xlu0 }
 0x136   : > { %530 = vst [vmem:[%s1035_s18 + $0x238] sm:$0xff] %v446_v38  ;;  %498 = vst [vmem:[%s1035_s18 + $0x138] sm:$0xff] %v414_v39 }
 0x139   : > { %v447_v40 = vpop.trf.xlu1  ;;  %v415_v41 = vpop.trf.xlu0 }
 0x13a   : > { %532 = vst [vmem:[%s1035_s18 + $0x248] sm:$0xff] %v447_v40  ;;  %500 = vst [vmem:[%s1035_s18 + $0x148] sm:$0xff] %v415_v41 }
 0x13d   : > { %v448_v42 = vpop.trf.xlu1  ;;  %v416_v43 = vpop.trf.xlu0 }
 0x13e   : > { %534 = vst [vmem:[%s1035_s18 + $0x258] sm:$0xff] %v448_v42  ;;  %502 = vst [vmem:[%s1035_s18 + $0x158] sm:$0xff] %v416_v43 }
 0x141   : > { %v449_v44 = vpop.trf.xlu1  ;;  %v417_v45 = vpop.trf.xlu0 }
 0x142   : > { %536 = vst [vmem:[%s1035_s18 + $0x268] sm:$0xff] %v449_v44  ;;  %504 = vst [vmem:[%s1035_s18 + $0x168] sm:$0xff] %v417_v45 }
 0x145   : > { %v450_v46 = vpop.trf.xlu1  ;;  %v418_v47 = vpop.trf.xlu0 }
 0x146   : > { %538 = vst [vmem:[%s1035_s18 + $0x278] sm:$0xff] %v450_v46  ;;  %506 = vst [vmem:[%s1035_s18 + $0x178] sm:$0xff] %v418_v47 }
 0x149   : > { %v451_v48 = vpop.trf.xlu1  ;;  %v419_v49 = vpop.trf.xlu0 }
 0x14a   : > { %540 = vst [vmem:[%s1035_s18 + $0x288] sm:$0xff] %v451_v48  ;;  %508 = vst [vmem:[%s1035_s18 + $0x188] sm:$0xff] %v419_v49 }
 0x14d   : > { %v452_v50 = vpop.trf.xlu1  ;;  %v420_v51 = vpop.trf.xlu0 }
 0x14e   : > { %542 = vst [vmem:[%s1035_s18 + $0x298] sm:$0xff] %v452_v50  ;;  %510 = vst [vmem:[%s1035_s18 + $0x198] sm:$0xff] %v420_v51 }
 0x151   : > { %v453_v52 = vpop.trf.xlu1  ;;  %v421_v53 = vpop.trf.xlu0 }
 0x152   : > { %544 = vst [vmem:[%s1035_s18 + $0x2a8] sm:$0xff] %v453_v52  ;;  %512 = vst [vmem:[%s1035_s18 + $0x1a8] sm:$0xff] %v421_v53 }
 0x155   : > { %v454_v54 = vpop.trf.xlu1  ;;  %v422_v55 = vpop.trf.xlu0 }
 0x156   : > { %546 = vst [vmem:[%s1035_s18 + $0x2b8] sm:$0xff] %v454_v54  ;;  %514 = vst [vmem:[%s1035_s18 + $0x1b8] sm:$0xff] %v422_v55 }
 0x159   : > { %v455_v56 = vpop.trf.xlu1  ;;  %v423_v57 = vpop.trf.xlu0 }
 0x15a   : > { %548 = vst [vmem:[%s1035_s18 + $0x2c8] sm:$0xff] %v455_v56  ;;  %516 = vst [vmem:[%s1035_s18 + $0x1c8] sm:$0xff] %v423_v57 }
 0x15d   : > { %v456_v58 = vpop.trf.xlu1  ;;  %v424_v59 = vpop.trf.xlu0 }
 0x15e   : > { %550 = vst [vmem:[%s1035_s18 + $0x2d8] sm:$0xff] %v456_v58  ;;  %518 = vst [vmem:[%s1035_s18 + $0x1d8] sm:$0xff] %v424_v59 }
 0x161   : > { %v457_v60 = vpop.trf.xlu1  ;;  %v425_v61 = vpop.trf.xlu0 }
 0x162   : > { %552 = vst [vmem:[%s1035_s18 + $0x2e8] sm:$0xff] %v457_v60  ;;  %520 = vst [vmem:[%s1035_s18 + $0x1e8] sm:$0xff] %v425_v61 }
 0x165   : > { %v458_v62 = vpop.trf.xlu1  ;;  %v426_v63 = vpop.trf.xlu0 }
 0x166   : > { %554 = vst [vmem:[%s1035_s18 + $0x2f8] sm:$0xff] %v458_v62  ;;  %522 = vst [vmem:[%s1035_s18 + $0x1f8] sm:$0xff] %v426_v63 }
 0x167   : > { %788 = shalt.err (!%p785_p6)
}
 0x168   : > { %s789_s4 = scalar_lea.hbm %s1168_s28, 12288  ;;  %s793_s13 = scalar_lea.hbm %s1221_s1, 24576 }
 0x169   : > { %p790_p4 = scmp.ne.s32.totalorder %s1168_s28, %s789_s4  ;;  %p794_p13 = scmp.lt.s32.totalorder %s1168_s28, %s1221_s1 }
 0x16a   : > { %p795_p2 = scmp.lt.s32.totalorder %s793_s13, %s789_s4 }
 0x16b   : > { %p791_p7 = pnand %p790_p4, %p924_p9 }
 0x16c   : > { %p796_p8 = por %p795_p2, %p794_p13 }
 0x16d   : > { %p792_p10 = pneg %p791_p7 }
 0x16f   : > { %p797_p12 = pnand %p796_p8, %p792_p10 }
 0x171   : > { %800 = shalt.err (!%p797_p12)
}
 0x172   : > { %s861_s22 = smov 256   ;;  %s862_s23 = smov 16  }
 0x173   : > { %683 = dma.vmem_to_hbm [thread:$0]  (%p924_p9), %s1170_s25, 12288, %s1168_s28, %s556_s9, %s861_s22, %s861_s22, %s862_s23  }
 0x174 PF: > { %s589_s18 = sand.u32 1, %s835_s6   ;;  %p1227_p0 = scmp.ge.s32.totalorder %s855_s11, 2 }
 0x175   : > { %s590_s24 = scalar_lea.sflag [#allocation4], %s589_s18 }
 0x176   : > { %p690_p1 = pnand %p1227_p0, %p931_p11 }
 0x178   : > { %p691_p3 = pneg %p690_p1 }
 0x17a   : > { %830 = dma.done.wait (%p691_p3), %s590_s24, 12288  }
 0x17b   : > { %832 = vsyncadd (%p691_p3), %s590_s24, 4294955008  ;;  %s17_s11 = sadd.s32 1, %s855_s11   ;;  %s1228_s6 = smov %s839_s7 }
 0x17c   : > { %p14_p5 = scmp.ge.s32.totalorder %s17_s11, 4   ;;  %s1229_s7 = smov %s843_s8 }
 0x17d   : > { %s1230_s8 = smov %s929_s20  ;;  %s1231_s9 = smov %s851_s10 }
 0x17e   : > { %s1232_s10 = smov %s1234_s14  ;;  %16 = sbr.rel (!%p14_p5) target bundleno = 6 (0x6), region = 69 }
 0x183   :  { %595 = vsyncpa [#allocation3], 1 }
 0x184   :  { %597 = vsyncpa [#allocation3 + $0x1], 1 }
 0x185   :  { %598 = vsyncpa [#allocation4], 1 }
 0x186   :  { %600 = vsyncpa [#allocation4 + $0x1], 1 }

</bundles_post_ra>
